<compile_context>
chip_gen: v5e
topology: v5e:2x2
jax: 0.10.0
libtpu: 0.0.40
codegen_flags: <defaults>
</compile_context>

<pallas_src>
import functools

import jax
import jax.numpy as jnp
from jax import lax
from jax.experimental import pallas as pl
from jax.experimental.pallas import tpu as pltpu


_SUBLANES = 8
_ROW_TILE_CAP = 2048                 # ~0.56 KiB/row (x + out) => well under VMEM limits
_VMEM_LIMIT = 32 * 1024 * 1024       # safe on v5e/v6e (128 MiB) and v7x (64 MiB physical)
_EPS = 1e-12                         # F.normalize default eps


def _round_up(x, m):
    return (x + m - 1) // m * m


def _row_tile(n_rows):
    """Row tile: multiple of 8, as large as possible, but >= 2 grid steps when n allows
    (so both v7x TensorCores get work)."""
    half = _round_up(pl.cdiv(n_rows, 2), _SUBLANES)
    return max(_SUBLANES, min(_ROW_TILE_CAP, half))


# ----------------------------------------------------------------------------- Pallas kernels

def _linear_kernel(x_ref, w_ref, b_ref, o_ref):
    # x_ref: [tile_n, K]   w_ref: [K, C]   b_ref: [1, C]   o_ref: [tile_n, C]
    o_ref[...] = (
        jnp.dot(x_ref[...], w_ref[...], preferred_element_type=jnp.float32) + b_ref[...]
    )


def _normed_linear_kernel(x_ref, wn_ref, o_ref, *, eps):
    # wn_ref is W already column-normalized in the wrapper (constant across the grid).
    # Per-row normalization of x: x * rsqrt(max(sum(x^2), eps^2)) == x / max(||x||, eps).
    x = x_ref[...]
    sumsq = jnp.sum(x * x, axis=1, keepdims=True)          # [tile_n, 1]
    inv_norm = lax.rsqrt(jnp.maximum(sumsq, eps * eps))    # EUP rsqrt on the reduction
    o_ref[...] = jnp.dot(x * inv_norm, wn_ref[...], preferred_element_type=jnp.float32)


# ----------------------------------------------------------------------------- wrapper

def classifier_forward(x, params, *, use_norm=False):
    """x: [N, feat_in] float32. Returns [N, num_classes] float32."""
    n, feat_in = x.shape
    w = params["w"]                     # [feat_in, num_classes]
    num_classes = w.shape[1]

    tile_n = _row_tile(n)
    grid = (pl.cdiv(n, tile_n),)        # partial final block handled by Pallas (OOB writes dropped)

    compiler_params = pltpu.CompilerParams(
        dimension_semantics=("parallel",),   # independent row tiles -> megacore on v7x
        vmem_limit_bytes=_VMEM_LIMIT,
    )
    cost = pl.CostEstimate(
        flops=2 * n * feat_in * num_classes,
        transcendentals=n if use_norm else 0,
        bytes_accessed=4 * (n * feat_in + feat_in * num_classes + num_classes
                            + n * num_classes),
    )

    x_spec = pl.BlockSpec((tile_n, feat_in), lambda i: (i, 0))
    w_spec = pl.BlockSpec((feat_in, num_classes), lambda i: (0, 0))
    o_spec = pl.BlockSpec((tile_n, num_classes), lambda i: (i, 0))
    out_shape = jax.ShapeDtypeStruct((n, num_classes), jnp.float32)

    if use_norm:
        # Hoist the constant W column-normalization out of the grid: one tiny
        # (feat_in x num_classes) op per forward instead of per grid step / per core.
        w_sumsq = jnp.sum(w * w, axis=0, keepdims=True)
        wn = w * lax.rsqrt(jnp.maximum(w_sumsq, _EPS * _EPS))
        return pl.pallas_call(
            functools.partial(_normed_linear_kernel, eps=_EPS),
            out_shape=out_shape,
            grid=grid,
            in_specs=[x_spec, w_spec],
            out_specs=o_spec,
            compiler_params=compiler_params,
            cost_estimate=cost,
        )(x, wn)

    b_spec = pl.BlockSpec((1, num_classes), lambda i: (0, 0))
    return pl.pallas_call(
        _linear_kernel,
        out_shape=out_shape,
        grid=grid,
        in_specs=[x_spec, w_spec, b_spec],
        out_specs=o_spec,
        compiler_params=compiler_params,
        cost_estimate=cost,
    )(x, w, params["b"])


# ----------------------------------------------------------------------------- parameters

def init_params(key, feat_in, num_classes, *, use_norm=False):
    """Matches Classifier.__init__ + _weights_init (weights stored as [in, out])."""
    kw, kb = jax.random.split(key)

    if use_norm:
        # NormedLinear: Tensor(in, out).uniform_(-1,1).renorm_(2, dim=1, maxnorm=1e-5).mul_(1e5)
        # (per-column L2 norm clamped to <= 1e-5, then scaled by 1e5).
        w = jax.random.uniform(kw, (feat_in, num_classes), jnp.float32, -1.0, 1.0)
        col_norm = jnp.sqrt(jnp.sum(w * w, axis=0, keepdims=True))
        scale = jnp.where(col_norm > 1e-5, 1e-5 / col_norm, 1.0) * 1e5
        return {"w": w * scale}

    # nn.Linear + kaiming_normal_(weight): std = sqrt(2 / fan_in), fan_in = in_features.
    std = (2.0 / feat_in) ** 0.5
    w = jax.random.normal(kw, (feat_in, num_classes), jnp.float32) * std   # stored [in, out]
    bound = 1.0 / (feat_in ** 0.5)                                         # default bias init
    b = jax.random.uniform(kb, (1, num_classes), jnp.float32, -bound, bound)
    return {"w": w, "b": b}


# ----------------------------------------------------------------------------- main

if __name__ == "__main__":
    key = jax.random.PRNGKey(0)
    k_param, k_x = jax.random.split(key)

    feat_in, num_classes = 64, 10
    eps = _EPS

    fwd_lin = jax.jit(functools.partial(classifier_forward, use_norm=False))
    fwd_nrm = jax.jit(functools.partial(classifier_forward, use_norm=True))

    params = init_params(k_param, feat_in, num_classes, use_norm=False)
    params_n = init_params(k_param, feat_in, num_classes, use_norm=True)

    # batch=8 exercises the single-tile path; batch=12 exercises a 2-step grid with a
    # partial (out-of-bounds) final block.
    for batch in (8, 12):
        x = jax.random.normal(jax.random.fold_in(k_x, batch), (batch, feat_in), jnp.float32)

        # --- use_norm=False (nn.Linear) --------------------------------------
        out = jax.block_until_ready(fwd_lin(x, params))
        ref = x @ params["w"] + params["b"][0]
        assert out.shape == (batch, num_classes), out.shape
        assert jnp.all(jnp.isfinite(out))
        assert jnp.allclose(out, ref, atol=1e-5, rtol=1e-5)

        # --- use_norm=True (NormedLinear) -------------------------------------
        out_n = jax.block_until_ready(fwd_nrm(x, params_n))
        xn = x / jnp.maximum(jnp.linalg.norm(x, axis=1, keepdims=True), eps)
        wn = params_n["w"] / jnp.maximum(
            jnp.linalg.norm(params_n["w"], axis=0, keepdims=True), eps)
        ref_n = xn @ wn
        assert out_n.shape == (batch, num_classes), out_n.shape
        assert jnp.all(jnp.isfinite(out_n))
        assert jnp.allclose(out_n, ref_n, atol=1e-5, rtol=1e-5)

    print("KERNEL_OK")
</pallas_src>

<mosaic_0001>
module attributes {stable_mosaic.version = 11 : i64} {
  func.func @_linear_kernel(%arg0: i32, %arg1: memref<8x64xf32, #tpu.memory_space<vmem>>, %arg2: memref<64x10xf32, #tpu.memory_space<vmem>>, %arg3: memref<1x10xf32, #tpu.memory_space<vmem>>, %arg4: memref<8x10xf32, #tpu.memory_space<vmem>>) attributes {dimension_semantics = [#tpu.dimension_semantics<parallel>], iteration_bounds = array<i64: 1>, scalar_prefetch = 0 : i64, scratch_operands = 0 : i64, tpu.core_type = #tpu.core_type<tc>, window_params = [{transform_indices = @transform_0, window_bounds = array<i64: 8, 64>}, {pipeline_mode = #tpu.pipeline_mode<synchronous>, transform_indices = @transform_1, window_bounds = array<i64: 64, 10>}, {pipeline_mode = #tpu.pipeline_mode<synchronous>, transform_indices = @transform_2, window_bounds = array<i64: 1, 10>}, {transform_indices = @transform_3, window_bounds = array<i64: 8, 10>}]} {
    %c0 = arith.constant 0 : index
    %c0_0 = arith.constant 0 : index
    %0 = vector.load %arg1[%c0, %c0_0] : memref<8x64xf32, #tpu.memory_space<vmem>>, vector<8x64xf32>
    %c0_1 = arith.constant 0 : index
    %c0_2 = arith.constant 0 : index
    %1 = vector.load %arg2[%c0_1, %c0_2] : memref<64x10xf32, #tpu.memory_space<vmem>>, vector<64x10xf32>
    %cst = arith.constant dense<0.000000e+00> : vector<8x10xf32>
    %2 = tpu.matmul %0, %1, %cst {dimension_numbers = #tpu.dot_dimension_numbers<[1], [0], [0], [1], [0, 0, 1, 1], [], []>} : vector<8x64xf32>, vector<64x10xf32>, vector<8x10xf32> -> vector<8x10xf32>
    %c0_3 = arith.constant 0 : index
    %c0_4 = arith.constant 0 : index
    %3 = vector.load %arg3[%c0_3, %c0_4] : memref<1x10xf32, #tpu.memory_space<vmem>>, vector<1x10xf32>
    %4 = vector.broadcast %3 : vector<1x10xf32> to vector<8x10xf32>
    %5 = arith.addf %2, %4 : vector<8x10xf32>
    %c0_5 = arith.constant 0 : index
    %c0_6 = arith.constant 0 : index
    %6 = vector.load %arg4[%c0_5, %c0_6] : memref<8x10xf32, #tpu.memory_space<vmem>>, vector<8x10xf32>
    tpu.vector_store %arg4[%c0_5, %c0_6], %5 {strides = array<i32>} : memref<8x10xf32, #tpu.memory_space<vmem>>, vector<8x10xf32>,
    return
  }
  func.func @transform_0(%arg0: i32) -> (i32, i32) {
    %c0_i32 = arith.constant 0 : i32
    %c0_i32_0 = arith.constant 0 : i32
    return %arg0, %c0_i32 : i32, i32
  }
  func.func @transform_1(%arg0: i32) -> (i32, i32) {
    %c0_i32 = arith.constant 0 : i32
    %c0_i32_0 = arith.constant 0 : i32
    %c0_i32_1 = arith.constant 0 : i32
    return %c0_i32, %c0_i32_0 : i32, i32
  }
  func.func @transform_2(%arg0: i32) -> (i32, i32) {
    %c0_i32 = arith.constant 0 : i32
    %c0_i32_0 = arith.constant 0 : i32
    %c0_i32_1 = arith.constant 0 : i32
    return %c0_i32, %c0_i32_0 : i32, i32
  }
  func.func @transform_3(%arg0: i32) -> (i32, i32) {
    %c0_i32 = arith.constant 0 : i32
    %c0_i32_0 = arith.constant 0 : i32
    return %arg0, %c0_i32 : i32, i32
  }
}

</mosaic_0001>

<bundles_post_ra>
// kernel: classifier_forward.1
= control target key start
LH: loop header
LB: loop body
LE: loop exit
PB: predicated region body
PF: predicated region fallthrough
CT: control target
= control target key end

     0   :  { %s153_s0 = inlined_call_operand.vmem [shape: f32[8,64], index: 0, kind: input, shape index: {}]   ;;  %s154_s1 = inlined_call_operand.vmem [shape: f32[64,10], index: 1, kind: input, shape index: {}]   ;;  %s155_s2 = inlined_call_operand.vmem [shape: f32[1,10], index: 2, kind: input, shape index: {}]   ;;  %s156_s3 = inlined_call_operand.hbm [shape: f32[8,10], index: 3, kind: output, shape index: {}]  }
   0x1   :  { %v23_v0 = vld [vmem:[%s154_s1 + $0x38] sm:$0xff]  ;;  %v22_v1 = vld [vmem:[%s154_s1 + $0x30] sm:$0xff]  ;;  %v21_v2 = vld [vmem:[%s154_s1 + $0x28] sm:$0xff] }
   0x2   :  { %40 = vmatpush.msra.mxu0 %v23_v0 }
   0x4   :  { %41 = vmatpush.msra.mxu0 %v22_v1 }
   0x5   :  { %8 = vsyncpa [#allocation3], 0  ;;  %v20_v3 = vld [vmem:[%s154_s1 + $0x20] sm:$0xff]  ;;  %v19_v4 = vld [vmem:[%s154_s1 + $0x18] sm:$0xff]  ;;  %vm28_vm0 = vcmask 523264   ;;  %s99_s5 = smov [#allocation2]  }
   0x6   :  { %42 = vmatpush.msra.mxu0 %v21_v2  ;;  %v18_v5 = vld [vmem:[%s154_s1 + $0x10] sm:$0xff]  ;;  %v17_v6 = vld [vmem:[%s154_s1 + $0x8] sm:$0xff]  ;;  %v16_v7 = vld [vmem:[%s154_s1] sm:$0xff]  ;;  %s59_s6 = sshll.u32 %s99_s5, 4  ;;  %s61_s9 = sshll.u32 %s156_s3, 4  ;;  %vm52_vm1 = vcmask 80896   ;;  %s60_s6 = int_to_ptr.vmem [resolvable:$true] %s59_s6  ;;  %s62_s9 = int_to_ptr.hbm [resolvable:$true] %s61_s9 }
   0x7   :  { %v15_v8 = vld [vmem:[%s153_s0] sm:$0xff] }
   0x8   :  { %43 = vmatpush.msra.mxu0 %v20_v3  ;;  %v72_v9 = vld [vmem:[%s155_s2] ss:$0 sm:$0xff] }
   0xa   :  { %44 = vmatpush.msra.mxu0 %v19_v4 }
   0xc   :  { %45 = vmatpush.msra.mxu0 %v18_v5 }
   0xe   :  { %46 = vmatpush.msra.mxu0 %v17_v6 }
  0x10   :  { %47 = vmatpush.msra.mxu0 %v16_v7 }
  0x11   :  { %70 = vmatmul.msk.f32.vlgmr.msra.gmra.mxu0 %vm28_vm0, %v15_v8 }
  0x8e   :  { %v49_v10 = vpop.f32.mrf.mxu0 }
  0x8f   :  { %v50_v11 = vadd.f32 %v72_v9, %v49_v10 }
  0x91   :  { %53 = vst.msk [vmem:[#allocation2] sm:$0xff] %vm52_vm1, %v50_v11 }
  0x92   :  { %64 = dma.vmem_to_hbm [thread:$0]  %s60_s6, 128, %s62_s9, [#allocation3]  }
  0x93   :  { %97 = dma.done.wait [#allocation3], 128  }
  0x94   :  { %98 = vsyncadd [#allocation3], 4294967168 }
  0x95   :  { %69 = vsyncpa [#allocation3], 1 }

</bundles_post_ra>
